<compile_context>
chip_gen: v6e
topology: v6e:2x2x1
jax: 0.10.0
libtpu: 0.0.40
codegen_flags: <defaults>
</compile_context>

<pallas_src>
from functools import partial

import jax
import jax.numpy as jnp
from jax.experimental import pallas as pl
from jax.experimental.pallas import tpu as pltpu


def _copy_kernel(x_ref, o_ref):
    # Pure vectorized copy of one tile; the "op" is the data move.
    o_ref[...] = x_ref[...]


_LANE_WIDTHS = (4096, 2048, 1024, 512, 256, 128)
_TILE_BYTES = 8 * 1024 * 1024    # per-buffer block budget (v7x-tuned; fine on v5e/v6e)
_VMEM_LIMIT = 48 * 1024 * 1024   # in+out double-buffered (4x tile) + headroom; < v7x 64 MiB


def _cdiv(a, b):
    return -(-a // b)


def _round_down(a, m):
    return (a // m) * m


def _round_up(a, m):
    return _cdiv(a, m) * m


def _sublane(itemsize):
    return {4: 8, 2: 16, 1: 32}.get(itemsize, 8)


def _alias_touch(x):
    """Default path: alias the input HBM buffer into the output and touch one
    minimal legal block so the custom call performs a (self-)write.  The data
    is already in place; no bulk HBM traffic is issued by this kernel."""
    N, F = x.shape
    itemsize = jnp.dtype(x.dtype).itemsize
    rb = N if N < 8 else 8          # legal: multiple of 8 or full dim
    cb = F if F < 128 else 128      # legal: multiple of 128 or full dim
    return pl.pallas_call(
        _copy_kernel,
        out_shape=jax.ShapeDtypeStruct((N, F), x.dtype),
        grid=(1,),
        in_specs=[pl.BlockSpec((rb, cb), lambda i: (0, 0))],
        out_specs=pl.BlockSpec((rb, cb), lambda i: (0, 0)),
        input_output_aliases={0: 0},
        cost_estimate=pl.CostEstimate(
            flops=0, transcendentals=0,
            bytes_accessed=2 * rb * cb * itemsize),
    )(x)


def _streamed_copy(x):
    """materialize=True path: full HBM->VMEM->HBM streamed copy into a fresh
    output buffer (lane-dense, double-buffered, cdiv-tiled)."""
    N, F = x.shape
    itemsize = jnp.dtype(x.dtype).itemsize
    sub = _sublane(itemsize)
    total = N * F
    cost = pl.CostEstimate(flops=0, transcendentals=0,
                           bytes_accessed=2 * total * itemsize)

    # Preferred: lane-dense slab (rows, lane), 1-D row grid, ragged last block
    # handled by cdiv + masking (no divisibility requirement).
    for lane in _LANE_WIDTHS:
        if total % lane:
            continue
        rows = total // lane
        if rows < sub:
            continue
        cap = max(sub, _round_down(_TILE_BYTES // (lane * itemsize), sub))
        rt = min(cap, _round_up(rows, sub))
        steps = _cdiv(rows, rt)
        if steps > 1 and steps % 2:  # v7x: balance the split across the 2 TCs
            steps += 1
            rt = min(rt, max(sub, _round_up(_cdiv(rows, steps), sub)))
        steps = _cdiv(rows, rt)
        slab = x.reshape(rows, lane)  # metadata-only re-view of the flat data
        return pl.pallas_call(
            _copy_kernel,
            out_shape=jax.ShapeDtypeStruct((rows, lane), x.dtype),
            grid=(steps,),
            in_specs=[pl.BlockSpec((rt, lane), lambda i: (i, 0))],
            out_specs=pl.BlockSpec((rt, lane), lambda i: (i, 0)),
            compiler_params=pltpu.CompilerParams(
                dimension_semantics=("parallel",),
                vmem_limit_bytes=_VMEM_LIMIT),
            cost_estimate=cost,
        )(slab)

    # Fallback for lane-awkward element counts: tile the original (N, F)
    # layout with a 2-D cdiv grid.  Never builds a whole-array VMEM block.
    cap_c = max(128, _round_down(_TILE_BYTES // (sub * itemsize), 128))
    ct = F if F < 128 else min(_round_up(F, 128), cap_c)
    r_cap = max(sub, _round_down(_TILE_BYTES // (ct * itemsize), sub))
    rt = N if N < sub else min(_round_up(N, sub), r_cap)
    grid = (_cdiv(N, rt), _cdiv(F, ct))
    return pl.pallas_call(
        _copy_kernel,
        out_shape=jax.ShapeDtypeStruct((N, F), x.dtype),
        grid=grid,
        in_specs=[pl.BlockSpec((rt, ct), lambda i, j: (i, j))],
        out_specs=pl.BlockSpec((rt, ct), lambda i, j: (i, j)),
        compiler_params=pltpu.CompilerParams(
            dimension_semantics=("parallel", "parallel"),
            vmem_limit_bytes=_VMEM_LIMIT),
        cost_estimate=cost,
    )(x)


@partial(jax.jit, static_argnums=(1, 2, 3), static_argnames=("materialize",))
def unflatten(x, C, H, W, *, materialize=False):
    """Pallas implementation of Unflatten.forward: (N, C*H*W) -> (N, C, H, W).

    materialize=False (default): alias the input buffer into the output (free,
    modulo one XLA-inserted copy when x is not donatable).
    materialize=True: explicit streamed copy into a fresh HBM buffer.
    """
    N, F = x.shape
    if F != C * H * W:
        raise ValueError(f"feature dim {F} != C*H*W = {C * H * W}")
    flat = _streamed_copy(x) if materialize else _alias_touch(x)
    # Metadata-only reshape (equivalent of torch.Tensor.view) — no compute.
    return flat.reshape(N, C, H, W)


if __name__ == "__main__":
    k0, k1, k2 = jax.random.split(jax.random.PRNGKey(0), 3)

    # Module defaults (DCGAN-MNIST): C=128, H=7, W=7; small batch.
    N, C, H, W = 2, 128, 7, 7
    x = jax.random.normal(k0, (N, C * H * W), dtype=jnp.float32)
    ref = x.reshape(N, C, H, W)

    # Default (alias/stub) path, called with a NON-donated input: correctness
    # of the partial-write + alias pattern is checked element-wise.
    out = jax.block_until_ready(unflatten(x, C, H, W))
    assert out.shape == (N, C, H, W) and out.dtype == x.dtype
    assert bool(jnp.array_equal(out, ref))

    # Explicit streamed-copy path.
    out_m = jax.block_until_ready(unflatten(x, C, H, W, materialize=True))
    assert bool(jnp.array_equal(out_m, ref))

    # Larger batch: lane-dense (294, 4096) f32 slab on the materialize path.
    N2 = 192
    x2 = jax.random.normal(k1, (N2, C * H * W), dtype=jnp.float32)
    ref2 = x2.reshape(N2, C, H, W)
    assert bool(jnp.array_equal(jax.block_until_ready(unflatten(x2, C, H, W)), ref2))
    assert bool(jnp.array_equal(
        jax.block_until_ready(unflatten(x2, C, H, W, materialize=True)), ref2))

    # Lane-awkward element count exercising the generic 2-D fallback tiling.
    N3, C3, H3, W3 = 6, 3, 5, 5
    x3 = jax.random.normal(k2, (N3, C3 * H3 * W3), dtype=jnp.float32)
    ref3 = x3.reshape(N3, C3, H3, W3)
    assert bool(jnp.array_equal(jax.block_until_ready(unflatten(x3, C3, H3, W3)), ref3))
    assert bool(jnp.array_equal(
        jax.block_until_ready(unflatten(x3, C3, H3, W3, materialize=True)), ref3))

    print("KERNEL_OK")
</pallas_src>

<mosaic_0001>
module attributes {stable_mosaic.version = 11 : i64} {
  func.func @_copy_kernel(%arg0: i32, %arg1: memref<2x128xf32, #tpu.memory_space<vmem>>, %arg2: memref<2x128xf32, #tpu.memory_space<vmem>>) attributes {dimension_semantics = [#tpu.dimension_semantics<arbitrary>], iteration_bounds = array<i64: 1>, scalar_prefetch = 0 : i64, scratch_operands = 0 : i64, tpu.core_type = #tpu.core_type<tc>, window_params = [{transform_indices = @transform_0, window_bounds = array<i64: 2, 128>}, {transform_indices = @transform_1, window_bounds = array<i64: 2, 128>}]} {
    %c0 = arith.constant 0 : index
    %c0_0 = arith.constant 0 : index
    %0 = vector.load %arg1[%c0, %c0_0] : memref<2x128xf32, #tpu.memory_space<vmem>>, vector<2x128xf32>
    %c0_1 = arith.constant 0 : index
    %c0_2 = arith.constant 0 : index
    %1 = vector.load %arg2[%c0_1, %c0_2] : memref<2x128xf32, #tpu.memory_space<vmem>>, vector<2x128xf32>
    tpu.vector_store %arg2[%c0_1, %c0_2], %0 {strides = array<i32>} : memref<2x128xf32, #tpu.memory_space<vmem>>, vector<2x128xf32>,
    return
  }
  func.func @transform_0(%arg0: i32) -> (i32, i32) {
    %c0_i32 = arith.constant 0 : i32
    %c0_i32_0 = arith.constant 0 : i32
    %c0_i32_1 = arith.constant 0 : i32
    return %c0_i32, %c0_i32_0 : i32, i32
  }
  func.func @transform_1(%arg0: i32) -> (i32, i32) {
    %c0_i32 = arith.constant 0 : i32
    %c0_i32_0 = arith.constant 0 : i32
    %c0_i32_1 = arith.constant 0 : i32
    return %c0_i32, %c0_i32_0 : i32, i32
  }
}

</mosaic_0001>

<bundles_post_ra>
// kernel: unflatten.1
= control target key start
LH: loop header
LB: loop body
LE: loop exit
PB: predicated region body
PF: predicated region fallthrough
CT: control target
= control target key end

     0   :  { %s30_s0 = inlined_call_operand.vmem [shape: f32[2,6272], index: 0, kind: input, shape index: {}, may-alias: {0,1}]   ;;  %s31_s1 = inlined_call_operand.vmem [shape: f32[2,6272], index: 1, kind: output, shape index: {}, may-alias: {0,1}]  }
   0x1   :  { %v8_v0 = vld [vmem:[%s30_s0] sm:$0x3] }
   0x2   :  { %9 = vst [vmem:[%s31_s1] sm:$0x3] %v8_v0 }

</bundles_post_ra>
